<compile_context>
chip_gen: v7x
topology: tpu7x:2x2x1
jax: 0.10.0
libtpu: 0.0.40
codegen_flags: <defaults>
</compile_context>

<pallas_src>
import jax
import jax.numpy as jnp
from jax.experimental import pallas as pl
from jax.experimental.pallas import tpu as pltpu


def _snake_beta_kernel(x_ref, a_ref, inv_b_ref, o_ref):
    # x_ref / o_ref: (C_TILE, T_TILE); a_ref / inv_b_ref: (C_TILE, 1)
    x = x_ref[...]
    s = jnp.sin(x * a_ref[...])          # (C,1) broadcasts over lanes
    o_ref[...] = (x + inv_b_ref[...] * (s * s)).astype(o_ref.dtype)


def _pick_tile(dim, target, unit):
    """Full dim if it already fits the target (always a legal block shape),
    otherwise the largest multiple of the hardware unit (8 sublanes /
    128 lanes) that is <= target."""
    if dim <= target:
        return dim
    return max((target // unit) * unit, unit)


def snake_beta_pallas(x, alpha, beta, *, c_tile_target=256, t_tile_target=2048):
    """SnakeBeta forward. x: (B, C, T); alpha, beta: (C,) log-scale params."""
    B, C, T = x.shape

    # O(C) parameter transforms hoisted out of the bandwidth-bound tile loop.
    a = jnp.exp(alpha).astype(jnp.float32).reshape(C, 1)
    inv_b = (1.0 / (jnp.exp(beta).astype(jnp.float32) + 1e-9)).reshape(C, 1)

    c_tile = _pick_tile(C, c_tile_target, 8)
    t_tile = _pick_tile(T, t_tile_target, 128)
    grid = (B, pl.cdiv(C, c_tile), pl.cdiv(T, t_tile))

    # Default tiles: 256*2048*4 B = 2 MiB per block; 2x(in) + 2x(out)
    # double-buffering = 8 MiB, comfortably inside scoped VMEM everywhere.
    return pl.pallas_call(
        _snake_beta_kernel,
        out_shape=jax.ShapeDtypeStruct((B, C, T), x.dtype),
        grid_spec=pltpu.PrefetchScalarGridSpec(
            num_scalar_prefetch=0,
            grid=grid,
            in_specs=[
                pl.BlockSpec((pl.Squeezed(), c_tile, t_tile),
                             lambda b, c, t: (b, c, t)),
                pl.BlockSpec((c_tile, 1), lambda b, c, t: (c, 0)),
                pl.BlockSpec((c_tile, 1), lambda b, c, t: (c, 0)),
            ],
            out_specs=pl.BlockSpec((pl.Squeezed(), c_tile, t_tile),
                                   lambda b, c, t: (b, c, t)),
        ),
        compiler_params=pltpu.CompilerParams(
            dimension_semantics=("parallel", "parallel", "parallel"),
            vmem_limit_bytes=32 * 1024 * 1024,
        ),
    )(x, a, inv_b)


def snake_beta_ref(x, alpha, beta):
    a = jnp.exp(alpha)[None, :, None]
    b = jnp.exp(beta)[None, :, None]
    return x + 1.0 / (b + 1e-9) * jnp.sin(x * a) ** 2


if __name__ == "__main__":
    key = jax.random.PRNGKey(0)
    kx, ka, kb, kx2, ka2, kb2 = jax.random.split(key, 6)

    # Small shapes matching the module's forward (B, C, T).
    B, C, T = 2, 4, 16
    x = jax.random.normal(kx, (B, C, T), dtype=jnp.float32)
    alpha = 0.1 * jax.random.normal(ka, (C,), dtype=jnp.float32)
    beta = 0.1 * jax.random.normal(kb, (C,), dtype=jnp.float32)

    out = jax.block_until_ready(snake_beta_pallas(x, alpha, beta))
    ref = snake_beta_ref(x, alpha, beta)
    assert out.shape == (B, C, T)
    assert jnp.allclose(out, ref, atol=1e-5, rtol=1e-5), "mismatch vs reference"

    # Second small check exercising the tiled / partial-last-tile path
    # (T = 200 with a 128-lane tile -> masked writeback on the last block).
    B2, C2, T2 = 1, 8, 200
    x2 = jax.random.normal(kx2, (B2, C2, T2), dtype=jnp.float32)
    alpha2 = 0.1 * jax.random.normal(ka2, (C2,), dtype=jnp.float32)
    beta2 = 0.1 * jax.random.normal(kb2, (C2,), dtype=jnp.float32)

    out2 = jax.block_until_ready(
        snake_beta_pallas(x2, alpha2, beta2, c_tile_target=8, t_tile_target=128)
    )
    ref2 = snake_beta_ref(x2, alpha2, beta2)
    assert out2.shape == (B2, C2, T2)
    assert jnp.allclose(out2, ref2, atol=1e-5, rtol=1e-5), "tiled mismatch vs reference"

    print("KERNEL_OK")
</pallas_src>

<mosaic_0001>
module attributes {stable_mosaic.version = 11 : i64} {
  func.func @_snake_beta_kernel(%arg0: i32, %arg1: i32, %arg2: i32, %arg3: memref<1x4x16xf32, #tpu.memory_space<vmem>>, %arg4: memref<4x1xf32, #tpu.memory_space<vmem>>, %arg5: memref<4x1xf32, #tpu.memory_space<vmem>>, %arg6: memref<1x4x16xf32, #tpu.memory_space<vmem>>) attributes {dimension_semantics = [#tpu.dimension_semantics<parallel>, #tpu.dimension_semantics<parallel>, #tpu.dimension_semantics<parallel>], iteration_bounds = array<i64: 2, 1, 1>, scalar_prefetch = 0 : i64, scratch_operands = 0 : i64, tpu.core_type = #tpu.core_type<tc>, window_params = [{transform_indices = @transform_0, window_bounds = array<i64: 1, 4, 16>}, {transform_indices = @transform_1, window_bounds = array<i64: 4, 1>}, {transform_indices = @transform_2, window_bounds = array<i64: 4, 1>}, {transform_indices = @transform_3, window_bounds = array<i64: 1, 4, 16>}]} {
    %c0 = arith.constant 0 : index
    %c0_0 = arith.constant 0 : index
    %c0_1 = arith.constant 0 : index
    %0 = vector.load %arg3[%c0, %c0_0, %c0_1] : memref<1x4x16xf32, #tpu.memory_space<vmem>>, vector<1x4x16xf32>
    %1 = vector.shape_cast %0 : vector<1x4x16xf32> to vector<4x16xf32>
    %c0_2 = arith.constant 0 : index
    %c0_3 = arith.constant 0 : index
    %2 = vector.load %arg4[%c0_2, %c0_3] : memref<4x1xf32, #tpu.memory_space<vmem>>, vector<4x1xf32>
    %3 = vector.broadcast %2 : vector<4x1xf32> to vector<4x16xf32>
    %4 = arith.mulf %1, %3 : vector<4x16xf32>
    %5 = math.sin %4 : vector<4x16xf32>
    %c0_4 = arith.constant 0 : index
    %c0_5 = arith.constant 0 : index
    %6 = vector.load %arg5[%c0_4, %c0_5] : memref<4x1xf32, #tpu.memory_space<vmem>>, vector<4x1xf32>
    %7 = arith.mulf %5, %5 : vector<4x16xf32>
    %8 = vector.broadcast %6 : vector<4x1xf32> to vector<4x16xf32>
    %9 = arith.mulf %8, %7 : vector<4x16xf32>
    %10 = arith.addf %1, %9 : vector<4x16xf32>
    %c0_6 = arith.constant 0 : index
    %c0_7 = arith.constant 0 : index
    %c0_8 = arith.constant 0 : index
    %11 = vector.load %arg6[%c0_6, %c0_7, %c0_8] : memref<1x4x16xf32, #tpu.memory_space<vmem>>, vector<1x4x16xf32>
    %12 = vector.shape_cast %11 : vector<1x4x16xf32> to vector<4x16xf32>
    %13 = vector.shape_cast %10 : vector<4x16xf32> to vector<1x4x16xf32>
    tpu.vector_store %arg6[%c0_6, %c0_7, %c0_8], %13 {strides = array<i32>} : memref<1x4x16xf32, #tpu.memory_space<vmem>>, vector<1x4x16xf32>,
    return
  }
  func.func @transform_0(%arg0: i32, %arg1: i32, %arg2: i32) -> (i32, i32, i32) {
    %c0_i32 = arith.constant 0 : i32
    return %arg0, %arg1, %arg2 : i32, i32, i32
  }
  func.func @transform_1(%arg0: i32, %arg1: i32, %arg2: i32) -> (i32, i32) {
    %c0_i32 = arith.constant 0 : i32
    %c0_i32_0 = arith.constant 0 : i32
    return %arg1, %c0_i32 : i32, i32
  }
  func.func @transform_2(%arg0: i32, %arg1: i32, %arg2: i32) -> (i32, i32) {
    %c0_i32 = arith.constant 0 : i32
    %c0_i32_0 = arith.constant 0 : i32
    return %arg1, %c0_i32 : i32, i32
  }
  func.func @transform_3(%arg0: i32, %arg1: i32, %arg2: i32) -> (i32, i32, i32) {
    %c0_i32 = arith.constant 0 : i32
    return %arg0, %arg1, %arg2 : i32, i32, i32
  }
}

</mosaic_0001>

<bundles_post_ra>
// kernel: tpu_custom_call.1
= control target key start
LH: loop header
LB: loop body
LE: loop exit
PB: predicated region body
PF: predicated region fallthrough
CT: control target
= control target key end

     0   :  { %8 = vsyncpa [#allocation3], 0  ;;  %s831_s0 = inlined_call_operand.vmem [shape: f32[2,4,16], index: 0, kind: input, shape index: {}]   ;;  %s832_s1 = inlined_call_operand.vmem [shape: f32[4,1], index: 1, kind: input, shape index: {}]   ;;  %s833_s2 = inlined_call_operand.vmem [shape: f32[4,1], index: 2, kind: input, shape index: {}]   ;;  %s834_s3 = inlined_call_operand.hbm [shape: f32[2,4,16], index: 3, kind: output, shape index: {}]  }
   0x1   :  { %10 = vsyncpa [#allocation3 + $0x1], 0  ;;  %s688_s12 = smov 0   ;;  %s690_s13 = smov 0  }
   0x2   :  { %s692_s14 = smov 0   ;;  %s694_s15 = smov 0  }
   0x3   :  { %s696_s16 = smov 0   ;;  %s698_s17 = smov 0  }
   0x4 LB: > { %s492_s18 = sadd.s32 4294967295, %s658_s17   ;;  %s493_s19 = sadd.s32 4294967294, %s658_s17   ;;  %s658_s17 = sphi %s698_s17, %s16_s17   ;;  %s654_s16 = sphi %s696_s16, %s841_s16   ;;  %s650_s15 = sphi %s694_s15, %s840_s15   ;;  %s646_s14 = sphi %s692_s14, %s839_s14   ;;  %s642_s13 = sphi %s690_s13, %s838_s13   ;;  %s638_s12 = sphi %s688_s12, %s837_s12  }
   0x5   : > { %s35_s20 = sadd.s32 1, %s654_s16  ;;  %s128_s21 = sadd.s32 1, %s646_s14 }
   0x6   : > { %p37_p0 = scmp.ge.s32.totalorder %s35_s20, 2  ;;  %p138_p1 = scmp.ne.s32.totalorder %s646_s14, %s642_s13 }
   0x7   : > { %p139_p2 = scmp.eq.s32.totalorder %s492_s18, 1  ;;  %p144_p3 = scmp.ne.s32.totalorder %s642_s13, %s638_s12 }
   0x8   : > { %s843_s20 = smov (%p37_p0, %s35_s20), 0  ;;  %p145_p5 = scmp.eq.s32.totalorder %s493_s19, 1 }
   0x9   : > { %p728_p4 = por %p139_p2, %p138_p1  ;;  %s121_s23 = ssub.s32 %s654_s16, %s843_s20 }
   0xa   : > { %p498_p6 = scmp.ge.s32.totalorder %s658_s17, 1  ;;  %p126_p7 = scmp.eq.s32.totalorder %s121_s23, 0 }
   0xb   : > { %p735_p8 = por %p145_p5, %p144_p3  ;;  %p190_p9 = scmp.lt.s32.totalorder %s658_s17, 3 }
   0xc   : > { %s741_s25 = scalar_select %p126_p7, %s646_s14, %s128_s21  }
   0xd   : > { %p191_p10 = pnand %p498_p6, %p190_p9 }
   0xe   : > { %v246_v0 = vld [vmem:[%s832_s1] sm:$0xf] (!%p191_p10)  ;;  %v660_v1 = vmov (!%p191_p10), 0   ;;  %p227_p11 = scmp.lt.s32.totalorder (!%p191_p10), %s650_s15, 1  ;;  %v661_v16 = vmov (!%p191_p10), 683565275  }
   0xf   : > { %194 = sbr.rel (%p191_p10) target bundleno = 245 (0xf5), region = 32  ;;  %575 = vset.pattern.permute.xlu0 (!%p191_p10), %v660_v1  ;;  %v357_v2 = vld [vmem:[%s833_s2] sm:$0xf] (!%p191_p10)  ;;  %v662_v18 = vmov (!%p191_p10), 2475754826   ;;  %s224_s8 = sand.u32 (!%p191_p10), 1, %s642_s13  }
  0x10   : > { %249 = vperm.xlu0 (!%p191_p10), %575, %v246_v0   ;;  %v663_v21 = vmov (!%p191_p10), 2131351028   ;;  %v664_v24 = vmov (!%p191_p10), 2102212464   ;;  %v665_v27 = vmov (!%p191_p10), 920167782  }
  0x11   : > { %v666_v30 = vmov (!%p191_p10), 1326507024   ;;  %s499_s9 = sshll.u32 (!%p191_p10), %s224_s8, 2  ;;  %s506_s10 = sshll.u32 (!%p191_p10), %s650_s15, 6  ;;  %vm366_vm13 = vcmask (!%p191_p10), 125952  }
  0x12   : > { %s226_s11 = scalar_lea.vmem (!%p191_p10), [#allocation2], %s499_s9  ;;  %s784_s23 = scalar_lea.hbm (!%p191_p10), %s834_s3, %s506_s10 }
  0x13   : > { %s384_s18 = sshll.u32 (!%p191_p10), %s226_s11, 4  ;;  %s369_s26 = scalar_lea.sflag (!%p191_p10), [#allocation3], %s224_s8  ;;  %s786_s18 = int_to_ptr.vmem [resolvable:$true] %s384_s18 }
  0x14   : > { %361 = vperm.xlu0 (!%p191_p10), %575, %v357_v2   ;;  %s580_s27 = scalar_lea.vmem (!%p191_p10), %s786_s18, 64 }
  0x15   : > { %p581_p12 = scmp.ne.s32.totalorder (!%p191_p10), %s786_s18, %s580_s27 }
  0x16   : > { %s228_s30 = scalar_select %p227_p11, %s650_s15, 1 }
  0x17   : > { %p582_p13 = pnand %p581_p12, %p728_p4  ;;  %s667_s15 = smov [#allocation2]  }
  0x18   : > { %s500_s4 = sshll.u32 %s228_s30, 2  ;;  %s584_s28 = sshll.u32 %s667_s15, 4  ;;  %s585_s28 = int_to_ptr.vmem [resolvable:$false] %s584_s28 }
  0x19   : > { %s236_s7 = scalar_lea.vmem %s831_s0, %s500_s4  ;;  %p583_p0 = pneg %p582_p13 }
  0x1a   : > { %v754_v3 = vld [vmem:[%s236_s7] sm:$0xf]  ;;  %s586_s29 = scalar_lea.vmem %s585_s28, 128  ;;  %p587_p1 = scmp.lt.s32.totalorder %s786_s18, %s585_s28 }
  0x1b   : > { %p588_p2 = scmp.lt.s32.totalorder %s586_s29, %s580_s27 }
  0x1d   : > { %p589_p3 = por %p588_p2, %p587_p1 }
  0x1f   : > { %p590_p5 = pnand %p589_p3, %p583_p0 }
  0x8f   : > { %v250_v4 = vpop.permute.xlu0 %249 }
  0x90   : > { %v757_v5 = vmul.f32 %v250_v4, %v754_v3 }
  0x92   : > { %v256_v6 = vand.u32 2139095040, %v757_v5  ;;  %v253_v10 = vand.u32 2147483647, %v757_v5  ;;  %vm255_vm7 = vcmp.lt.s32.totalorder %v757_v5, 0  ;;  %vm345_vm12 = vweird.f32 %v757_v5 }
  0x94   : > { %v257_v7 = vshrl.u32 %v256_v6, 23  ;;  %v260_v13 = vand.u32 8388607, %v253_v10  ;;  %vm254_vm8 = vcmp.le.f32.partialorder %v253_v10, 0.7853982 }
  0x96   : > { %v501_v8 = vadd.s32 4294967169, %v257_v7  ;;  %v261_v32 = vor.u32 8388608, %v260_v13 }
  0x98   : > { %v263_v9 = vadd.s32 1, %v501_v8  ;;  %v301_v46 = vshll.u32 %v261_v32, 8 }
  0x9a   : > { %vm264_vm0 = vcmp.gt.s32.totalorder %v263_v9, 0 }
  0x9b   : > { %v265_v11 = vsel %vm264_vm0, %v263_v9, 0 }
  0x9c   : > { %v267_v12 = vand.u32 31, %v265_v11  ;;  %v266_v15 = vshrl.u32 %v265_v11, 5 }
  0x9e   : > { %v268_v14 = vsub.s32 32, %v267_v12  ;;  %v270_v17 = vshll.u32 %v661_v16, %v267_v12  ;;  %v273_v19 = vshll.u32 %v662_v18, %v267_v12  ;;  %v276_v23 = vshll.u32 %v663_v21, %v267_v12 }
  0x9f   : > { %v279_v26 = vshll.u32 %v664_v24, %v267_v12  ;;  %v282_v29 = vshll.u32 %v665_v27, %v267_v12  ;;  %vm285_vm1 = vcmp.lt.s32.totalorder %v266_v15, 1  ;;  %vm288_vm2 = vcmp.lt.s32.totalorder %v266_v15, 4 }
  0xa0   : > { %v271_v20 = vshrl.u32 %v662_v18, %v268_v14  ;;  %v274_v22 = vshrl.u32 %v663_v21, %v268_v14  ;;  %v277_v25 = vshrl.u32 %v664_v24, %v268_v14  ;;  %v280_v28 = vshrl.u32 %v665_v27, %v268_v14 }
  0xa1   : > { %v283_v31 = vshrl.u32 %v666_v30, %v268_v14  ;;  %v269_v41 = vshrl.u32 %v661_v16, %v268_v14  ;;  %vm287_vm3 = vcmp.lt.s32.totalorder %v266_v15, 3  ;;  %vm286_vm4 = vcmp.lt.s32.totalorder %v266_v15, 2 }
  0xa2   : > { %v272_v33 = vor.u32 %v271_v20, %v270_v17  ;;  %v275_v34 = vor.u32 %v274_v22, %v273_v19  ;;  %v278_v35 = vor.u32 %v277_v25, %v276_v23  ;;  %v281_v36 = vor.u32 %v280_v28, %v279_v26 }
  0xa3   : > { %v284_v37 = vor.u32 %v283_v31, %v282_v29 }
  0xa4   : > { %v290_v38 = vsel %vm288_vm2, %v278_v35, 2102212464  ;;  %v293_v39 = vsel %vm285_vm1, %v272_v33, %v275_v34  ;;  %v297_v40 = vsel %vm285_vm1, %v275_v34, %v278_v35  ;;  %v294_v42 = vsel %vm288_vm2, %v281_v36, 920167782 }
  0xa5   : > { %v298_v43 = vsel %vm288_vm2, %v284_v37, 1326507024  ;;  %v295_v44 = vsel %vm287_vm3, %v278_v35, %v294_v42  ;;  %v289_v47 = vsel %vm285_vm1, %v269_v41, %v272_v33  ;;  %v291_v48 = vsel %vm287_vm3, %v275_v34, %v290_v38 }
  0xa6   : > { %v299_v45 = vsel %vm287_vm3, %v281_v36, %v298_v43  ;;  %v296_v49 = vsel %vm286_vm4, %v293_v39, %v295_v44  ;;  %v292_v55 = vsel %vm286_vm4, %v289_v47, %v291_v48  ;;  %v362_v36 = vpop.permute.xlu0 %361 }
  0xa7   : > { %v300_v50 = vsel %vm286_vm4, %v297_v40, %v299_v45  ;;  %v766_v53 = vmul.u32.u64.low %v301_v46, %v296_v49  ;;  %v767_v54 = vmul.u32.u64.high %v301_v46, %v296_v49, %v766_v53  ;;  %v308_v57 = vmul.u32 %v301_v46, %v292_v55 }
  0xa8   : > { %v763_v51 = vmul.u32.u64.low %v301_v46, %v300_v50  ;;  %v764_v52 = vmul.u32.u64.high %v301_v46, %v300_v50, %v763_v51 }
  0xa9   : > { %v311_v56 = vadd.s32 1, %v767_v54 }
  0xaa   : > { %vm310_vm5 = vc.u32 %v764_v52, %v766_v53  ;;  %v309_v7 = vadd.s32 %v766_v53, %v764_v52 }
  0xab   : > { %v312_v58 = vsel %vm310_vm5, %v311_v56, %v767_v54 }
  0xac   : > { %v313_v59 = vadd.s32 %v312_v58, %v308_v57 }
  0xae   : > { %v314_v60 = vadd.s32 536870912, %v313_v59 }
  0xb0   : > { %v315_v61 = vshrl.u32 %v314_v60, 30 }
  0xb2   : > { %v316_v62 = vshll.u32 %v315_v61, 30  ;;  %v339_v20 = vsub.s32 4, %v315_v61 }
  0xb4   : > { %v317_v63 = vsub.s32 %v313_v59, %v316_v62  ;;  %v340_v23 = vsel %vm255_vm7, %v339_v20, %v315_v61 }
  0xb5   : > { %v342_v25 = vsel %vm254_vm8, 0, %v340_v23 }
  0xb6   : > { %v319_v0 = vsub.s32 0, %v317_v63  ;;  %v346_v26 = vadd.s32 3, %v342_v25 }
  0xb8   : > { %v502_v1 = vmin.u32 %v319_v0, %v317_v63  ;;  %v347_v27 = vand.u32 3, %v346_v26 }
  0xba   : > { %v321_v2 = vclz %v502_v1  ;;  %vm352_vm9 = vcmp.eq.s32.totalorder %v347_v27, 2  ;;  %vm349_vm10 = vcmp.eq.s32.totalorder %v347_v27, 0  ;;  %vm348_vm11 = vcmp.lt.s32.totalorder %v347_v27, 2 }
  0xbc   : > { %v503_v4 = vadd.s32 4294967294, %v321_v2 }
  0xbe   : > { %vm504_vm6 = vcmp.lt.s32.totalorder %v503_v4, 0 }
  0xbf   : > { %v324_v6 = vsel %vm504_vm6, 0, %v503_v4 }
  0xc0   : > { %v325_v8 = vsub.s32 32, %v324_v6  ;;  %v329_v9 = vsub.s32 4294967266, %v324_v6  ;;  %v326_v11 = vshll.u32 %v317_v63, %v324_v6 }
  0xc2   : > { %v327_v12 = vshrl.u32 %v309_v7, %v325_v8  ;;  %v330_v13 = vadd.s32 127, %v329_v9 }
  0xc4   : > { %v328_v14 = vor.u32 %v327_v12, %v326_v11  ;;  %v331_v15 = vshll.u32 %v330_v13, 23 }
  0xc6   : > { %v332_v16 = vor.u32 4788187, %v331_v15  ;;  %v335_v18 = vcvt.s32.f32 %v328_v14 }
  0xc8   : > { %v333_v17 = vand.u32 2147483647, %v332_v16 }
  0xca   : > { %v336_v19 = vmul.f32 %v335_v18, %v333_v17 }
  0xcc   : > { %v337_v21 = vxor.u32 2147483648, %v336_v19 }
  0xce   : > { %v338_v22 = vsel %vm255_vm7, %v337_v21, %v336_v19 }
  0xcf   : > { %v341_v24 = vsel %vm254_vm8, %v757_v5, %v338_v22 }
  0xd0   : > { %576 = vcosq.f32 %v341_v24 }
  0xd1   : > { %578 = vsinq.f32 %v341_v24 }
  0xda   : > { %v577_v28 = vpop.eup %576 }
  0xdb   : > { %v579_v29 = vpop.eup %578  ;;  %v353_v30 = vxor.u32 2147483648, %v577_v28 }
  0xdc   : > { %v350_v31 = vxor.u32 2147483648, %v579_v29 }
  0xdd   : > { %v354_v32 = vsel %vm352_vm9, %v353_v30, %v579_v29 }
  0xde   : > { %v351_v10 = vsel %vm349_vm10, %v577_v28, %v350_v31 }
  0xdf   : > { %v355_v33 = vsel %vm348_vm11, %v351_v10, %v354_v32 }
  0xe0   : > { %v356_v34 = vsel %vm345_vm12, nan, %v355_v33 }
  0xe1   : > { %v358_v35 = vmul.f32 %v356_v34, %v356_v34 }
  0xe3   : > { %v364_v37 = vmul.f32 %v362_v36, %v358_v35 }
  0xe5   : > { %v365_v38 = vadd.f32 %v364_v37, %v754_v3 }
  0xe7   : > { %367 = vst.msk [vmem:[%s226_s11] sm:$0xf] %vm366_vm13, %v365_v38 }
  0xe8   : > { %593 = shalt.err (!%p590_p5)
}
  0xe9   : > { %s594_s30 = scalar_lea.hbm %s784_s23, 64  ;;  %s598_s6 = scalar_lea.hbm %s834_s3, 128 }
  0xea   : > { %p595_p6 = scmp.ne.s32.totalorder %s784_s23, %s594_s30  ;;  %p599_p10 = scmp.lt.u32.totalorder %s784_s23, %s834_s3 }
  0xeb   : > { %p600_p11 = scmp.lt.u32.totalorder %s598_s6, %s594_s30  ;;  %p602_p13 = scmp.lt.u32.totalorder %s594_s30, %s784_s23 }
  0xec   : > { %p596_p7 = pnand %p595_p6, %p728_p4 }
  0xed   : > { %p601_p12 = por %p600_p11, %p599_p10 }
  0xee   : > { %p597_p9 = pneg %p596_p7 }
  0xef   : > { %p603_p0 = por %p602_p13, %p601_p12 }
  0xf1   : > { %p604_p1 = pnand %p603_p0, %p597_p9 }
  0xf3   : > { %607 = shalt.err (!%p604_p1)
}
  0xf4   : > { %513 = dma.vmem_to_hbm [thread:$0]  (%p728_p4), %s786_s18, 64, %s784_s23, %s369_s26  }
  0xf5 PF: > { %p519_p2 = scmp.ge.s32.totalorder %s658_s17, 2  ;;  %s396_s9 = sand.u32 1, %s638_s12  }
  0xf6   : > { %s397_s10 = scalar_lea.sflag [#allocation3], %s396_s9 }
  0xf7   : > { %p516_p3 = pnand %p519_p2, %p735_p8 }
  0xf9   : > { %633 = dma.done.wait (!%p516_p3), %s397_s10, 64  }
  0xfa   : > { %635 = vsyncadd (!%p516_p3), %s397_s10, 4294967232  ;;  %s16_s17 = sadd.s32 1, %s658_s17   ;;  %s837_s12 = smov %s642_s13 }
  0xfb   : > { %p13_p5 = scmp.ge.s32.totalorder %s16_s17, 4   ;;  %s838_s13 = smov %s646_s14 }
  0xfc   : > { %s839_s14 = smov %s741_s25  ;;  %s840_s15 = smov %s654_s16 }
  0xfd   : > { %s841_s16 = smov %s843_s20  ;;  %15 = sbr.rel (!%p13_p5) target bundleno = 4 (0x4), region = 73 }
 0x104   :  { %402 = vsyncpa [#allocation3], 1 }
 0x105   :  { %404 = vsyncpa [#allocation3 + $0x1], 1 }

</bundles_post_ra>
